<compile_context>
chip_gen: v7x
topology: tpu7x:2x2x1
jax: 0.10.0
libtpu: 0.0.40
codegen_flags: <defaults>
</compile_context>

<pallas_src>
import math
import functools

import jax
import jax.numpy as jnp
from jax import lax
from jax.experimental import pallas as pl
from jax.experimental.pallas import tpu as pltpu


def _round_up(a: int, b: int) -> int:
    return ((a + b - 1) // b) * b


def _round_down(a: int, b: int) -> int:
    return max(b, (a // b) * b)


def _vmem_capacity_bytes() -> int:
    """Per-TensorCore VMEM capacity; conservative default if the query fails."""
    try:
        cap = int(pltpu.get_tpu_info().vmem_capacity_bytes)
        if cap > 0:
            return cap
    except Exception:
        pass
    return 64 * 1024 * 1024  # v7x per-core VMEM (smallest across v5e/v6e/v7x)


# --------------------------------------------------------------------------
# Resident-table path: multi-hot x (block-diagonal) table on the MXU.
# --------------------------------------------------------------------------
def _embed_onehot_kernel(ids_ref, lut_ref, o_ref, *, scale):
    """Embed R*g tokens per grid step.

    ids_ref: (R, g) int32; column j holds ids pre-offset by j*V (or -1 = masked).
    lut_ref: (g*V, g*D) VMEM-resident (block-diagonal when g > 1) table.
    o_ref:   (R, g*D) lane-dense packed output tile.
    """
    R, g = ids_ref.shape
    gV = lut_ref.shape[0]

    ids = ids_ref[...]                                     # (R, g) int32
    col = lax.broadcasted_iota(jnp.int32, (R, gV), 1)      # (R, g*V)
    hot = col == ids[:, 0:1]
    for j in range(1, g):                                  # multi-hot over packed cols
        hot = jnp.logical_or(hot, col == ids[:, j:j + 1])

    emb = jnp.dot(hot.astype(lut_ref.dtype), lut_ref[...],
                  preferred_element_type=jnp.float32)      # (R, g*D) f32
    o_ref[...] = (emb * scale).astype(o_ref.dtype)


# --------------------------------------------------------------------------
# Large-vocab fallback: table stays in HBM, DMA-gather only the needed rows.
# --------------------------------------------------------------------------
def _embed_gather_kernel(ids_ref, lut_ref, o_ref, rows_ref, sem_ref, *,
                         scale, tokens_per_tile, window):
    """ids_ref: (n_pad,) int32 in SMEM (scalar prefetch); lut_ref: (V, D) in HBM;
    rows_ref: (T, D) VMEM scratch; keeps up to `window` row DMAs in flight."""
    base = pl.program_id(0) * tokens_per_tile

    def row_copy(i):
        tok = ids_ref[base + i]
        return pltpu.make_async_copy(lut_ref.at[pl.ds(tok, 1), :],
                                     rows_ref.at[pl.ds(i, 1), :],
                                     sem_ref.at[0])

    @pl.loop(0, window)
    def _prime(i):
        row_copy(i).start()

    @pl.loop(0, tokens_per_tile)
    def _step(i):
        row_copy(i).wait()                 # every row copy moves the same #bytes
        @pl.when(i + window < tokens_per_tile)
        def _():
            row_copy(i + window).start()

    o_ref[...] = (rows_ref[...].astype(jnp.float32) * scale).astype(o_ref.dtype)


# --------------------------------------------------------------------------
# Wrapper
# --------------------------------------------------------------------------
def embeddings_forward(x, lut, *, block_tokens: int = 1024,
                       table_dtype=None, out_dtype=None,
                       force_gather: bool = False):
    """lut[x] * sqrt(d_model).  x: integer ids, lut: (V, D)."""
    V, D = lut.shape
    scale = math.sqrt(D)                         # sqrt of the true d_model
    out_dtype = jnp.dtype(out_dtype or lut.dtype)
    o_item = out_dtype.itemsize

    table = lut.astype(table_dtype) if table_dtype is not None else lut
    t_item = jnp.dtype(table.dtype).itemsize

    orig_shape = x.shape
    ids = x.reshape(-1).astype(jnp.int32)
    n = ids.shape[0]

    cap = _vmem_capacity_bytes()
    table_bytes = V * D * t_item
    # Resident iff table (counted 2x in case the constant-index BlockSpec is
    # still double-buffered; also budgets per-TC duplication on v7x megacore)
    # fits well inside per-core VMEM.
    use_resident = (not force_gather) and (2 * table_bytes <= int(0.45 * cap))

    if use_resident:
        # Lane-dense output packing: g tokens per 128-lane output row.
        g = 128 // D if (D < 128 and 128 % D == 0) else 1
        if g > 1 and 2 * g * g * table_bytes > int(0.45 * cap):
            g = 1                                   # packed table too big; stay unpacked
        gV, gD = g * V, g * D
        unit = 8 * g                                # tokens per minimal legal tile

        def tile_bytes(tok):                        # rough per-tile VMEM need
            r = tok // g
            ids_b = 2 * r * 128 * 4                 # (R, g) block, lane-padded, 2 buffers
            out_b = 2 * r * max(gD, 128) * o_item   # (R, gD) block, 2 buffers
            tmp_b = 4 * r * max(gV, 128) * 4 + 2 * r * max(gD, 128) * 4
            return ids_b + out_b + tmp_b

        table_resident = 2 * gV * gD * t_item
        budget = int(0.75 * cap)
        T = _round_down(min(block_tokens, _round_up(n, unit)), unit)
        while T > unit and table_resident + tile_bytes(T) > budget:
            T = _round_down(T // 2, unit)

        n_pad = _round_up(n, T)
        num_tiles = n_pad // T
        R = T // g

        # Mask OOB ids and pad tokens -> all-zero rows (PyTorch would raise).
        ids_p = jnp.where((ids >= 0) & (ids < V), ids, -1)
        ids_p = jnp.pad(ids_p, (0, n_pad - n), constant_values=-1)
        ids2 = ids_p.reshape(n_pad // g, g)
        if g > 1:
            # Offset packed column j into vocab block j so a single MXU
            # contraction against a block-diagonal table emits the packed row.
            offs = (jnp.arange(g, dtype=jnp.int32) * V)[None, :]
            ids2 = jnp.where(ids2 >= 0, ids2 + offs, -1)
            tbl = jnp.zeros((gV, gD), table.dtype)
            for j in range(g):
                tbl = tbl.at[j * V:(j + 1) * V, j * D:(j + 1) * D].set(table)
        else:
            tbl = table

        est = table_resident + tile_bytes(T)
        vmem_limit = min(int(0.9 * cap), max(32 * 1024 * 1024, 2 * est))

        out2d = pl.pallas_call(
            functools.partial(_embed_onehot_kernel, scale=scale),
            out_shape=jax.ShapeDtypeStruct((n_pad // g, gD), out_dtype),
            grid_spec=pltpu.PrefetchScalarGridSpec(
                num_scalar_prefetch=0,
                grid=(num_tiles,),
                in_specs=[
                    # Packed id tile for this grid step.
                    pl.BlockSpec((R, g), lambda i: (i, 0)),
                    # Full table, constant block index -> read from HBM once,
                    # VMEM-resident across the whole token loop.
                    pl.BlockSpec((gV, gD), lambda i: (0, 0)),
                ],
                # Lane-dense (R, g*D) output tiles (g*D == 128 when D < 128).
                out_specs=pl.BlockSpec((R, gD), lambda i: (i, 0)),
            ),
            compiler_params=pltpu.CompilerParams(
                dimension_semantics=("parallel",),
                vmem_limit_bytes=vmem_limit,
            ),
        )(ids2, tbl)

        out = out2d.reshape(n_pad, D)[:n]
        return out.reshape(*orig_shape, D)

    # ---------------- Large-vocab fallback: DMA row gather --------------------
    # TODO(synk): chunk the scalar-prefetched ids for extremely long sequences
    # (SMEM is small) and raise `window` / use per-slot semaphores if the row
    # DMAs ever become the bottleneck.
    unit = 8
    T = _round_down(min(block_tokens, 256, _round_up(n, unit)), unit)
    n_pad = _round_up(n, T)
    num_tiles = n_pad // T
    window = min(16, T)

    ids_p = jnp.clip(ids, 0, V - 1)          # PyTorch would raise on OOB ids
    ids_p = jnp.pad(ids_p, (0, n_pad - n))

    tile_est = T * D * (t_item + 2 * o_item) + T * 128 * 4
    vmem_limit = min(int(0.9 * cap), max(32 * 1024 * 1024, 4 * tile_est))

    out2d = pl.pallas_call(
        functools.partial(_embed_gather_kernel, scale=scale,
                          tokens_per_tile=T, window=window),
        out_shape=jax.ShapeDtypeStruct((n_pad, D), out_dtype),
        grid_spec=pltpu.PrefetchScalarGridSpec(
            num_scalar_prefetch=1,                          # ids -> SMEM
            grid=(num_tiles,),
            in_specs=[pl.BlockSpec(memory_space=pl.ANY)],   # table stays in HBM
            out_specs=pl.BlockSpec((T, D), lambda i, ids: (i, 0)),
            scratch_shapes=[
                pltpu.VMEM((T, D), table.dtype),
                pltpu.SemaphoreType.DMA((1,)),
            ],
        ),
        compiler_params=pltpu.CompilerParams(
            dimension_semantics=("arbitrary",),
            vmem_limit_bytes=vmem_limit,
        ),
    )(ids_p, table)

    return out2d[:n].reshape(*orig_shape, D)


if __name__ == "__main__":
    key = jax.random.PRNGKey(0)
    k_lut, k_x = jax.random.split(key)

    char_table_size = 16     # vocab size
    d_model = 32
    B, S = 2, 8

    lut = jax.random.normal(k_lut, (char_table_size, d_model), dtype=jnp.float32)
    x = jax.random.randint(k_x, (B, S), 0, char_table_size, dtype=jnp.int32)
    ref = jnp.take(lut, x, axis=0) * math.sqrt(d_model)

    # 1) f32 table, lane-dense packed output (d_model=32 -> 4 tokens / 128-lane row).
    out = jax.block_until_ready(embeddings_forward(x, lut))
    assert out.shape == (B, S, d_model)
    assert jnp.allclose(out, ref, atol=2e-3, rtol=2e-3), float(jnp.max(jnp.abs(out - ref)))

    # 2) Multi-tile grid + padding path (111 tokens, two 64-token tiles).
    x2 = jax.random.randint(jax.random.PRNGKey(1), (3, 37), 0, char_table_size, jnp.int32)
    ref2 = jnp.take(lut, x2, axis=0) * math.sqrt(d_model)
    out2 = jax.block_until_ready(embeddings_forward(x2, lut, block_tokens=64))
    assert jnp.allclose(out2, ref2, atol=2e-3, rtol=2e-3), float(jnp.max(jnp.abs(out2 - ref2)))

    # 3) bf16-resident table (half the table VMEM/HBM traffic), f32 accumulate/output.
    out3 = jax.block_until_ready(embeddings_forward(x, lut, table_dtype=jnp.bfloat16))
    assert jnp.allclose(out3, ref, atol=1e-2, rtol=1e-2), float(jnp.max(jnp.abs(out3 - ref)))

    print("KERNEL_OK")
</pallas_src>

<mosaic_0001>
module attributes {stable_mosaic.version = 11 : i64} {
  func.func @_embed_onehot_kernel(%arg0: i32, %arg1: memref<8x4xi32, #tpu.memory_space<vmem>>, %arg2: memref<64x128xf32, #tpu.memory_space<vmem>>, %arg3: memref<8x128xf32, #tpu.memory_space<vmem>>) attributes {dimension_semantics = [#tpu.dimension_semantics<parallel>], iteration_bounds = array<i64: 1>, scalar_prefetch = 0 : i64, scratch_operands = 0 : i64, tpu.core_type = #tpu.core_type<tc>, window_params = [{transform_indices = @transform_0, window_bounds = array<i64: 8, 4>}, {pipeline_mode = #tpu.pipeline_mode<synchronous>, transform_indices = @transform_1, window_bounds = array<i64: 64, 128>}, {transform_indices = @transform_2, window_bounds = array<i64: 8, 128>}]} {
    %c0 = arith.constant 0 : index
    %c0_0 = arith.constant 0 : index
    %0 = vector.load %arg1[%c0, %c0_0] : memref<8x4xi32, #tpu.memory_space<vmem>>, vector<8x4xi32>
    %1 = tpu.iota {dimensions = array<i32: 1>} : vector<8x64xi32>
    %2 = vector.extract_strided_slice %0 {offsets = [0, 0], sizes = [8, 1], strides = [1, 1]} : vector<8x4xi32> to vector<8x1xi32>
    %3 = vector.broadcast %2 : vector<8x1xi32> to vector<8x64xi32>
    %4 = arith.cmpi eq, %1, %3 : vector<8x64xi32>
    %5 = vector.extract_strided_slice %0 {offsets = [0, 1], sizes = [8, 1], strides = [1, 1]} : vector<8x4xi32> to vector<8x1xi32>
    %6 = vector.broadcast %5 : vector<8x1xi32> to vector<8x64xi32>
    %7 = arith.cmpi eq, %1, %6 : vector<8x64xi32>
    %8 = arith.ori %4, %7 : vector<8x64xi1>
    %9 = vector.extract_strided_slice %0 {offsets = [0, 2], sizes = [8, 1], strides = [1, 1]} : vector<8x4xi32> to vector<8x1xi32>
    %10 = vector.broadcast %9 : vector<8x1xi32> to vector<8x64xi32>
    %11 = arith.cmpi eq, %1, %10 : vector<8x64xi32>
    %12 = arith.ori %8, %11 : vector<8x64xi1>
    %13 = vector.extract_strided_slice %0 {offsets = [0, 3], sizes = [8, 1], strides = [1, 1]} : vector<8x4xi32> to vector<8x1xi32>
    %14 = vector.broadcast %13 : vector<8x1xi32> to vector<8x64xi32>
    %15 = arith.cmpi eq, %1, %14 : vector<8x64xi32>
    %16 = arith.ori %12, %15 : vector<8x64xi1>
    %17 = arith.extui %16 : vector<8x64xi1> to vector<8x64xi32>
    %18 = arith.sitofp %17 : vector<8x64xi32> to vector<8x64xf32>
    %c0_1 = arith.constant 0 : index
    %c0_2 = arith.constant 0 : index
    %19 = vector.load %arg2[%c0_1, %c0_2] : memref<64x128xf32, #tpu.memory_space<vmem>>, vector<64x128xf32>
    %cst = arith.constant dense<0.000000e+00> : vector<8x128xf32>
    %20 = tpu.matmul %18, %19, %cst {dimension_numbers = #tpu.dot_dimension_numbers<[1], [0], [0], [1], [0, 0, 1, 1], [], []>} : vector<8x64xf32>, vector<64x128xf32>, vector<8x128xf32> -> vector<8x128xf32>
    %cst_3 = arith.constant 5.65685415 : f32
    %21 = vector.broadcast %cst_3 : f32 to vector<8x128xf32>
    %22 = arith.mulf %20, %21 : vector<8x128xf32>
    %c0_4 = arith.constant 0 : index
    %c0_5 = arith.constant 0 : index
    %23 = vector.load %arg3[%c0_4, %c0_5] : memref<8x128xf32, #tpu.memory_space<vmem>>, vector<8x128xf32>
    tpu.vector_store %arg3[%c0_4, %c0_5], %22 {strides = array<i32>} : memref<8x128xf32, #tpu.memory_space<vmem>>, vector<8x128xf32>,
    return
  }
  func.func @transform_0(%arg0: i32) -> (i32, i32) {
    %c0_i32 = arith.constant 0 : i32
    %c0_i32_0 = arith.constant 0 : i32
    return %arg0, %c0_i32 : i32, i32
  }
  func.func @transform_1(%arg0: i32) -> (i32, i32) {
    %c0_i32 = arith.constant 0 : i32
    %c0_i32_0 = arith.constant 0 : i32
    %c0_i32_1 = arith.constant 0 : i32
    return %c0_i32, %c0_i32_0 : i32, i32
  }
  func.func @transform_2(%arg0: i32) -> (i32, i32) {
    %c0_i32 = arith.constant 0 : i32
    %c0_i32_0 = arith.constant 0 : i32
    return %arg0, %c0_i32 : i32, i32
  }
}

</mosaic_0001>

<bundles_post_ra>
// kernel: tpu_custom_call.1
= control target key start
LH: loop header
LB: loop body
LE: loop exit
PB: predicated region body
PF: predicated region fallthrough
CT: control target
= control target key end

     0   :  { %7 = vsyncpa [#allocation3], 0  ;;  %s308_s0 = inlined_call_operand.vmem [shape: s32[8,4], index: 0, kind: input, shape index: {}]   ;;  %s309_s1 = inlined_call_operand.hbm [shape: f32[64,128], index: 1, kind: input, shape index: {}]   ;;  %s310_s2 = inlined_call_operand.hbm [shape: f32[8,128], index: 2, kind: output, shape index: {}]  }
   0x1   :  { %8 = vsyncpa [#allocation4], 0  ;;  %s255_s9 = smov [#allocation2]   ;;  %s207_s13 = scalar_lea.hbm %s309_s1, 1024 }
   0x2   :  { %s16_s10 = sshll.u32 %s255_s9, 4  ;;  %p208_p0 = scmp.ne.s32.totalorder %s309_s1, %s207_s13  ;;  %s17_s10 = int_to_ptr.vmem [resolvable:$true] %s16_s10 }
   0x3   :  { %p211_p1 = scmp.lt.u32.totalorder %s207_s13, %s309_s1 }
   0x5   :  { %p213_p2 = pnand %p211_p1, %p208_p0 }
   0x7   :  { %216 = shalt.err (!%p213_p2)
}
   0x8   :  { %s217_s18 = scalar_lea.vmem %s17_s10, 1024  ;;  %p222_p4 = scmp.lt.s32.totalorder %s17_s10, %s17_s10 }
   0x9   :  { %p218_p3 = scmp.ne.s32.totalorder %s17_s10, %s217_s18  ;;  %p223_p5 = scmp.lt.s32.totalorder %s217_s18, %s217_s18 }
   0xb   :  { %p224_p6 = por %p223_p5, %p222_p4 }
   0xd   :  { %p225_p7 = pnand %p224_p6, %p218_p3 }
   0xf   :  { %228 = shalt.err (!%p225_p7)
}
  0x10   :  { %s256_s19 = smov 128   ;;  %s257_s20 = smov 8  }
  0x11   :  { %22 = dma.hbm_to_vmem [thread:$0]  %s309_s1, 1024, %s17_s10, [#allocation3], %s256_s19, %s256_s19, %s257_s20  }
  0x12   :  { %251 = dma.done.wait [#allocation3], 1024  }
  0x13   :  { %252 = vsyncadd [#allocation3], 4294966272  ;;  %v258_v0 = vmov 0   ;;  %v259_v1 = vmov 2   ;;  %v260_v2 = vmov 0.0|0.0   ;;  %v26_v3 = vld [vmem:[%s308_s0] sm:$0xff]  ;;  %v27_v19 = vlaneseq }
  0x14   :  { %202 = vset.pattern.permute.xlu0 %v258_v0  ;;  %204 = vset.pattern.permute.xlu1 %v259_v1  ;;  %v50_v4 = vld [vmem:[#allocation2] sm:$0xff]  ;;  %v51_v5 = vld [vmem:[#allocation2 + $0x8] sm:$0xff]  ;;  %v52_v7 = vld [vmem:[#allocation2 + $0x10] sm:$0xff]  ;;  %v261_v12 = vmov 1   ;;  %v262_v13 = vmov 3   ;;  %vm263_vm0 = vmmov 0  }
  0x15   :  { %179 = vmatprep.subr.bf16.mxu0 %v260_v2  ;;  %30 = vperm.xlu0 %202, %v26_v3   ;;  %v180_v6 = vpack.c.bf16 %v51_v5, %v50_v4  ;;  %v53_v8 = vld [vmem:[#allocation2 + $0x18] sm:$0xff]  ;;  %v54_v10 = vld [vmem:[#allocation2 + $0x20] sm:$0xff]  ;;  %v55_v11 = vld [vmem:[#allocation2 + $0x28] sm:$0xff]  ;;  %v264_v17 = vmov 0.0   ;;  %v28_v22 = vand.u32 127, %v27_v19  ;;  %vm58_vm7 = vcmask 523264  }
  0x16   :  { %39 = vperm.xlu1 %204, %v26_v3   ;;  %v183_v9 = vpack.c.bf16 %v53_v8, %v52_v7  ;;  %v186_v14 = vpack.c.bf16 %v55_v11, %v54_v10  ;;  %v56_v15 = vld [vmem:[#allocation2 + $0x30] sm:$0xff]  ;;  %v57_v16 = vld [vmem:[#allocation2 + $0x38] sm:$0xff]  ;;  %176 = vmatprep.mubr.msk.f32.mxu0 %vm263_vm0, %v264_v17  ;;  %s265_s0 = smov [#allocation5]  }
  0x17   :  { %181 = vmatpush3.bf16.msra.mxu0 %v180_v6  ;;  %v189_v18 = vpack.c.bf16 %v57_v16, %v56_v15  ;;  %s140_s1 = sshll.u32 %s265_s0, 4  ;;  %s141_s1 = int_to_ptr.vmem [resolvable:$true] %s140_s1 }
  0x18   :  { %182 = vmatprep.subr.bf16.mxu0 %v260_v2  ;;  %s229_s25 = scalar_lea.vmem %s141_s1, 128  ;;  %p234_p9 = scmp.lt.s32.totalorder %s141_s1, %s141_s1 }
  0x19   :  { %203 = vset.pattern.permute.xlu0 %v261_v12  ;;  %p230_p8 = scmp.ne.s32.totalorder %s141_s1, %s229_s25  ;;  %p235_p10 = scmp.lt.s32.totalorder %s229_s25, %s229_s25 }
  0x1a   :  { %205 = vset.pattern.permute.xlu1 %v262_v13  ;;  %34 = vperm.xlu0 %203, %v26_v3  }
  0x1b   :  { %44 = vperm.xlu1 %205, %v26_v3   ;;  %184 = vmatpush3.bf16.msra.mxu0 %v183_v9  ;;  %p236_p11 = por %p235_p10, %p234_p9 }
  0x1c   :  { %185 = vmatprep.subr.bf16.mxu0 %v260_v2 }
  0x1d   :  { %p237_p12 = pnand %p236_p11, %p230_p8 }
  0x1e   :  { %206 = vset.pattern.permute.xlu0 %v262_v13 }
  0x1f   :  { %187 = vmatpush3.bf16.msra.mxu0 %v186_v14 }
  0x20   :  { %188 = vmatprep.subr.bf16.mxu0 %v260_v2 }
  0x23   :  { %190 = vmatpush3.bf16.msra.mxu0 %v189_v18 }
  0x94   :  { %v31_v20 = vpop.permute.xlu0 %30 }
  0x95   :  { %v40_v21 = vpop.permute.xlu1 %39  ;;  %vm32_vm1 = vcmp.eq.s32.totalorder %v28_v22, %v31_v20 }
  0x96   :  { %vm41_vm4 = vcmp.eq.s32.totalorder %v28_v22, %v40_v21 }
  0x99   :  { %v35_v23 = vpop.permute.xlu0 %34 }
  0x9a   :  { %v45_v24 = vpop.permute.xlu1 %44  ;;  %vm36_vm2 = vcmp.eq.s32.totalorder %v28_v22, %v35_v23 }
  0x9b   :  { %vm46_vm3 = vcmp.eq.s32.totalorder %v28_v22, %v45_v24  ;;  %vm37_vm5 = vmor %vm32_vm1, %vm36_vm2 }
  0x9c   :  { %vm42_vm6 = vmor %vm37_vm5, %vm41_vm4 }
  0x9d   :  { %vm47_vm8 = vmor %vm42_vm6, %vm46_vm3 }
  0x9e   :  { %v149_v25 = vsel %vm47_vm8, 1.0, %v264_v17 }
  0x9f   :  { %177 = vmatmul.mubr.msk.f32.vlgmr.msra.gmra.mrb[0].mxu0 %vm58_vm7, %v149_v25 }
 0x172   :  { %v128_v26 = vpop.f32.mrb[0].mxu0 }
 0x173   :  { %v132_v27 = vmul.f32 5.656854, %v128_v26  ;;  %v178_v28 = vpop.f32.mrb[1].mxu0 }
 0x175   :  { %133 = vst [vmem:[#allocation5] sm:$0xff] %v132_v27 }
 0x176   :  { %240 = shalt.err (!%p237_p12)
}
 0x177   :  { %s241_s28 = scalar_lea.hbm %s310_s2, 128 }
 0x178   :  { %p242_p13 = scmp.ne.s32.totalorder %s310_s2, %s241_s28  ;;  %p245_p0 = scmp.lt.u32.totalorder %s241_s28, %s310_s2 }
 0x17a   :  { %p247_p1 = pnand %p245_p0, %p242_p13 }
 0x17c   :  { %250 = shalt.err (!%p247_p1)
}
 0x17d   :  { %143 = dma.vmem_to_hbm [thread:$0]  %s141_s1, 128, %s310_s2, [#allocation4]  }
 0x17e   :  { %253 = dma.done.wait [#allocation4], 128  }
 0x17f   :  { %254 = vsyncadd [#allocation4], 4294967168 }
 0x180   :  { %147 = vsyncpa [#allocation3], 1 }
 0x181   :  { %148 = vsyncpa [#allocation4], 1 }

</bundles_post_ra>
